<compile_context>
chip_gen: v5e
topology: v5e:2x2
jax: 0.10.0
libtpu: 0.0.40
codegen_flags: <defaults>
</compile_context>

<pallas_src>
import jax
import jax.numpy as jnp
import numpy as np
from jax.experimental import pallas as pl
from jax.experimental.pallas import tpu as pltpu

_VMEM_LIMIT = 48 * 1024 * 1024  # fits v5e/v6e/v7x physical VMEM with headroom


def _pick_batch_block(B, max_block=256):
    """Batch-tile size: whole batch if small, else a divisor that is a mult of 8."""
    if B <= max_block:
        return B
    for cand in range(max_block, 7, -8):
        if B % cand == 0:
            return cand
    return B


# --------------------------------------------------------------------------- #
# Generic row-tiled linear kernel:  y = x @ w + b   (used for the hoisted,
# once-per-sequence projections: i2h(batch_H)+b_h2h and emb@W_emb+b_lstm).
# --------------------------------------------------------------------------- #
def _proj_bias_kernel(x_ref, w_ref, b_ref, o_ref):
    f32 = jnp.float32
    acc = jnp.dot(x_ref[...], w_ref[...], preferred_element_type=f32)
    o_ref[...] = (acc + b_ref[...].astype(f32)).astype(o_ref.dtype)


def _linear_bias(x, w, b, out_dtype, block_rows=256):
    """Row-tiled, pipelined Pallas linear.  x:[R,K], w:[K,N], b:[1,N] -> [R,N]."""
    R, K = x.shape
    N = w.shape[1]
    if R <= block_rows:
        br, Rp = R, R
    else:
        br = block_rows
        Rp = ((R + br - 1) // br) * br
        if Rp != R:
            x = jnp.pad(x, ((0, Rp - R), (0, 0)))
    y = pl.pallas_call(
        _proj_bias_kernel,
        grid=(Rp // br,),
        in_specs=[
            pl.BlockSpec((br, K), lambda r: (r, 0)),
            pl.BlockSpec((K, N), lambda r: (0, 0)),   # K-resident weight
            pl.BlockSpec((1, N), lambda r: (0, 0)),
        ],
        out_specs=pl.BlockSpec((br, N), lambda r: (r, 0)),
        out_shape=jax.ShapeDtypeStruct((Rp, N), out_dtype),
        compiler_params=pltpu.CompilerParams(
            dimension_semantics=("parallel",),
            vmem_limit_bytes=_VMEM_LIMIT,
        ),
    )(x, w, b)
    return y[:R] if Rp != R else y


def precompute_batch_H_proj(batch_H, params, compute_dtype=jnp.float32):
    """i2h(batch_H) + b_h2h, computed ONCE per sequence (h/c independent)."""
    B, T, D = batch_H.shape
    H = params["w_h2h"].shape[0]
    w_i2h_T = jnp.transpose(params["w_i2h"]).astype(compute_dtype)   # [D, H]
    b_h2h = params["b_h2h"].reshape(1, H).astype(jnp.float32)
    out = _linear_bias(batch_H.reshape(B * T, D).astype(compute_dtype),
                       w_i2h_T, b_h2h, out_dtype=compute_dtype)
    return out.reshape(B, T, H)


# --------------------------------------------------------------------------- #
# FUSED decode kernel: all S steps inside one pallas_call (teacher forcing).
# grid = (batch_blocks["parallel"], steps["arbitrary"])
# --------------------------------------------------------------------------- #
def _attention_decode_kernel(
    h0_ref, c0_ref, bH_ref, bHp_ref, embg_ref,
    w_h2h_T_ref, w_score_ref, w_ctx_T_ref, w_hh_T_ref,
    hid_ref, c_fin_ref, alpha_ref, ctx_ref,
    h_state, c_state,
):
    f32 = jnp.float32
    s = pl.program_id(1)

    # Recurrent state lives in VMEM scratch; (re)initialize at step 0 of each
    # batch block — no HBM round-trip for h/c between steps.
    @pl.when(s == 0)
    def _():
        h_state[...] = h0_ref[...].astype(f32)
        c_state[...] = c0_ref[...].astype(f32)

    h_prev = h_state[...]                       # [Bb, H] f32
    c_prev = c_state[...]                       # [Bb, H] f32
    H = h_prev.shape[-1]

    w_h2h = w_h2h_T_ref[...]                    # [H, H]   (compute dtype)
    w_ctx = w_ctx_T_ref[...]                    # [D, 4H]
    w_hh = w_hh_T_ref[...]                      # [H, 4H]
    cd = w_h2h.dtype

    # prev_hidden_proj = h2h(h_prev)   (b_h2h already folded into bH_proj)
    h_proj = jnp.dot(h_prev.astype(cd), w_h2h, preferred_element_type=f32)    # [Bb, H]

    # tanh / softmax math stays f32 (v5e has no bf16 VPU/EUP)
    tanned = jnp.tanh(bHp_ref[...].astype(f32) + h_proj[:, None, :])          # [Bb, T, H]

    # score: Linear(H, 1, bias=False) — VPU multiply + lane reduce (small H)
    e = jnp.sum(tanned * w_score_ref[...][:, None, :], axis=-1)               # [Bb, T]

    # softmax over T (max-stabilized)
    e_max = jnp.max(e, axis=-1, keepdims=True)
    p = jnp.exp(e - e_max)
    alpha = p / jnp.sum(p, axis=-1, keepdims=True)                            # [Bb, T]

    # context = bmm(alpha^T, batch_H)
    context = jnp.sum(alpha[:, :, None] * bH_ref[...].astype(f32), axis=1)    # [Bb, D]

    # LSTM gates; the E-wide embedding matmul + both biases were hoisted out of
    # the step loop into embg (computed once per sequence).
    gates = (
        jnp.dot(context.astype(cd), w_ctx, preferred_element_type=f32)
        + jnp.dot(h_prev.astype(cd), w_hh, preferred_element_type=f32)
        + embg_ref[0].astype(f32)
    )                                                                         # [Bb, 4H]

    i_g = jax.nn.sigmoid(gates[:, 0 * H:1 * H])
    f_g = jax.nn.sigmoid(gates[:, 1 * H:2 * H])
    g_g = jnp.tanh(gates[:, 2 * H:3 * H])
    o_g = jax.nn.sigmoid(gates[:, 3 * H:4 * H])

    c_new = f_g * c_prev + i_g * g_g
    h_new = o_g * jnp.tanh(c_new)

    h_state[...] = h_new
    c_state[...] = c_new

    hid_ref[0] = h_new
    alpha_ref[0] = alpha
    ctx_ref[0] = context
    c_fin_ref[...] = c_new                      # resident across steps; flushed once


def attention_decode(prev_hidden, batch_H, char_embeddings_all, params,
                     compute_dtype=jnp.float32):
    """Teacher-forced fused decode over all steps in one pallas_call.

    char_embeddings_all: [S, B, E] (embeddings for every step, known up front).
    Returns (hiddens [S,B,H], c_final [B,H], alphas [S,B,T,1], contexts [S,B,D]).
    """
    h0, c0 = prev_hidden
    B, T, D = batch_H.shape
    S, _, E = char_embeddings_all.shape
    H = h0.shape[-1]
    f32 = jnp.float32
    cd = compute_dtype

    # ---- trace-time weight prep (free) ----
    w_h2h_T = jnp.transpose(params["w_h2h"]).astype(cd)          # [H, H]
    w_score = params["w_score"].reshape(1, H).astype(f32)        # [1, H]
    w_ih_T = jnp.transpose(params["w_ih"])                       # [D+E, 4H]
    w_ctx_T = w_ih_T[:D].astype(cd)                              # [D, 4H]
    w_emb_T = w_ih_T[D:].astype(f32)                             # [E, 4H]
    w_hh_T = jnp.transpose(params["w_hh"]).astype(cd)            # [H, 4H]
    b_lstm = (params["b_ih"] + params["b_hh"]).reshape(1, 4 * H).astype(f32)

    # ---- once-per-sequence hoisted projections (Pallas kernels) ----
    bH_proj = precompute_batch_H_proj(batch_H, params, compute_dtype=cd)       # [B,T,H]
    emb_gate = _linear_bias(
        char_embeddings_all.astype(f32).reshape(S * B, E), w_emb_T, b_lstm,
        out_dtype=f32).reshape(S, B, 4 * H)                                     # [S,B,4H]

    batch_H_c = batch_H.astype(cd)

    Bb = _pick_batch_block(B)
    nb = B // Bb

    in_specs = [
        pl.BlockSpec((Bb, H), lambda b, s: (b, 0)),            # h0
        pl.BlockSpec((Bb, H), lambda b, s: (b, 0)),            # c0
        pl.BlockSpec((Bb, T, D), lambda b, s: (b, 0, 0)),      # batch_H   (VMEM-resident over s)
        pl.BlockSpec((Bb, T, H), lambda b, s: (b, 0, 0)),      # bH_proj   (VMEM-resident over s)
        pl.BlockSpec((1, Bb, 4 * H), lambda b, s: (s, b, 0)),  # emb_gate  (per step)
        pl.BlockSpec((H, H), lambda b, s: (0, 0)),             # w_h2h_T
        pl.BlockSpec((1, H), lambda b, s: (0, 0)),             # w_score
        pl.BlockSpec((D, 4 * H), lambda b, s: (0, 0)),         # w_ctx_T
        pl.BlockSpec((H, 4 * H), lambda b, s: (0, 0)),         # w_hh_T
    ]
    out_specs = [
        pl.BlockSpec((1, Bb, H), lambda b, s: (s, b, 0)),      # hiddens (per step)
        pl.BlockSpec((Bb, H), lambda b, s: (b, 0)),            # c_final (resident)
        pl.BlockSpec((1, Bb, T), lambda b, s: (s, b, 0)),      # alphas
        pl.BlockSpec((1, Bb, D), lambda b, s: (s, b, 0)),      # contexts
    ]
    out_shape = [
        jax.ShapeDtypeStruct((S, B, H), f32),
        jax.ShapeDtypeStruct((B, H), f32),
        jax.ShapeDtypeStruct((S, B, T), f32),
        jax.ShapeDtypeStruct((S, B, D), f32),
    ]

    hiddens, c_final, alphas, contexts = pl.pallas_call(
        _attention_decode_kernel,
        grid=(nb, S),
        in_specs=in_specs,
        out_specs=out_specs,
        out_shape=out_shape,
        scratch_shapes=[pltpu.VMEM((Bb, H), f32),    # h state
                        pltpu.VMEM((Bb, H), f32)],   # c state
        compiler_params=pltpu.CompilerParams(
            dimension_semantics=("parallel", "arbitrary"),
            vmem_limit_bytes=_VMEM_LIMIT,
        ),
    )(h0.astype(f32), c0.astype(f32), batch_H_c, bH_proj, emb_gate,
      w_h2h_T, w_score, w_ctx_T, w_hh_T)

    return hiddens, c_final, alphas.reshape(S, B, T, 1), contexts


# --------------------------------------------------------------------------- #
# Per-step kernel (autoregressive inference path).
# --------------------------------------------------------------------------- #
def _attention_cell_kernel(
    h_ref, c_ref, bH_ref, bHp_ref, emb_ref,
    w_h2h_T_ref, w_score_ref, lstm_slab_ref,
    h_out, c_out, alpha_out, ctx_out,
):
    f32 = jnp.float32
    h_prev = h_ref[...].astype(f32)
    c_prev = c_ref[...].astype(f32)
    batch_H = bH_ref[...].astype(f32)
    bH_proj = bHp_ref[...].astype(f32)
    emb = emb_ref[...].astype(f32)

    _, T, D = batch_H.shape
    H = h_prev.shape[-1]
    E = emb.shape[-1]

    h_proj = jnp.dot(h_prev, w_h2h_T_ref[...].astype(f32), preferred_element_type=f32)
    tanned = jnp.tanh(bH_proj + h_proj[:, None, :])
    e = jnp.sum(tanned * w_score_ref[...].astype(f32)[:, None, :], axis=-1)   # [B, T]

    e_max = jnp.max(e, axis=-1, keepdims=True)
    p = jnp.exp(e - e_max)
    alpha = p / jnp.sum(p, axis=-1, keepdims=True)

    context = jnp.sum(alpha[:, :, None] * batch_H, axis=1)                    # [B, D]

    # Static slices of the packed LSTM weight slab (single DMA'd input).
    w_ctx = lstm_slab_ref[0:D, :]
    w_emb = lstm_slab_ref[D:D + E, :]
    w_hh = lstm_slab_ref[D + E:D + E + H, :]
    b = lstm_slab_ref[D + E + H:D + E + H + 1, :]

    gates = (jnp.dot(context, w_ctx, preferred_element_type=f32)
             + jnp.dot(emb, w_emb, preferred_element_type=f32)
             + jnp.dot(h_prev, w_hh, preferred_element_type=f32)
             + b)

    i_g = jax.nn.sigmoid(gates[:, 0 * H:1 * H])
    f_g = jax.nn.sigmoid(gates[:, 1 * H:2 * H])
    g_g = jnp.tanh(gates[:, 2 * H:3 * H])
    o_g = jax.nn.sigmoid(gates[:, 3 * H:4 * H])

    c_new = f_g * c_prev + i_g * g_g
    h_new = o_g * jnp.tanh(c_new)

    h_out[...] = h_new
    c_out[...] = c_new
    alpha_out[...] = alpha
    ctx_out[...] = context


def attention_cell(prev_hidden, batch_H, char_embeddings, params, batch_H_proj=None):
    """Single decode step (autoregressive path).  Matches AttentionCell.forward.

    Pass `batch_H_proj = precompute_batch_H_proj(batch_H, params)` to reuse the
    h-independent encoder projection across decode steps (recommended).
    Returns ((h_new, c_new), alpha[B,T,1], context[B,D]).
    """
    h_prev, c_prev = prev_hidden
    B, T, D = batch_H.shape
    H = h_prev.shape[-1]
    E = char_embeddings.shape[-1]
    f32 = jnp.float32

    if batch_H_proj is None:
        batch_H_proj = precompute_batch_H_proj(batch_H, params)

    # Trace-time weight prep: transpose to [in, out]; pack the three gate
    # weight matrices plus the folded bias into ONE slab -> single weight DMA.
    w_h2h_T = jnp.transpose(params["w_h2h"]).astype(f32)          # [H, H]
    w_score = params["w_score"].reshape(1, H).astype(f32)         # [1, H]
    w_ih_T = jnp.transpose(params["w_ih"]).astype(f32)            # [D+E, 4H]
    w_hh_T = jnp.transpose(params["w_hh"]).astype(f32)            # [H, 4H]
    b_lstm = (params["b_ih"] + params["b_hh"]).reshape(1, 4 * H).astype(f32)
    lstm_slab = jnp.concatenate([w_ih_T, w_hh_T, b_lstm], axis=0)  # [D+E+H+1, 4H]

    Bb = _pick_batch_block(B)
    nb = B // Bb

    in_specs = [
        pl.BlockSpec((Bb, H), lambda b: (b, 0)),
        pl.BlockSpec((Bb, H), lambda b: (b, 0)),
        pl.BlockSpec((Bb, T, D), lambda b: (b, 0, 0)),
        pl.BlockSpec((Bb, T, H), lambda b: (b, 0, 0)),
        pl.BlockSpec((Bb, E), lambda b: (b, 0)),
        pl.BlockSpec((H, H), lambda b: (0, 0)),
        pl.BlockSpec((1, H), lambda b: (0, 0)),
        pl.BlockSpec((D + E + H + 1, 4 * H), lambda b: (0, 0)),
    ]
    out_specs = [
        pl.BlockSpec((Bb, H), lambda b: (b, 0)),
        pl.BlockSpec((Bb, H), lambda b: (b, 0)),
        pl.BlockSpec((Bb, T), lambda b: (b, 0)),
        pl.BlockSpec((Bb, D), lambda b: (b, 0)),
    ]
    out_shape = [
        jax.ShapeDtypeStruct((B, H), f32),
        jax.ShapeDtypeStruct((B, H), f32),
        jax.ShapeDtypeStruct((B, T), f32),
        jax.ShapeDtypeStruct((B, D), f32),
    ]

    h_new, c_new, alpha, context = pl.pallas_call(
        _attention_cell_kernel,
        grid=(nb,),
        in_specs=in_specs,
        out_specs=out_specs,
        out_shape=out_shape,
        compiler_params=pltpu.CompilerParams(
            dimension_semantics=("parallel",),
            vmem_limit_bytes=_VMEM_LIMIT,
        ),
    )(h_prev, c_prev, batch_H, batch_H_proj, char_embeddings,
      w_h2h_T, w_score, lstm_slab)

    return (h_new, c_new), alpha.reshape(B, T, 1), context


# --------------------------------------------------------------------------- #
# Pure-JAX reference (mirrors the PyTorch forward exactly)
# --------------------------------------------------------------------------- #
def _reference(prev_hidden, batch_H, char_embeddings, params):
    h_prev, c_prev = prev_hidden
    bH_proj = jnp.einsum("btd,hd->bth", batch_H, params["w_i2h"])
    h_proj = h_prev @ params["w_h2h"].T + params["b_h2h"]
    e = jnp.einsum("bth,oh->bto", jnp.tanh(bH_proj + h_proj[:, None, :]),
                   params["w_score"])                                   # [B, T, 1]
    alpha = jax.nn.softmax(e, axis=1)
    context = jnp.einsum("bto,btd->bd", alpha, batch_H)
    x = jnp.concatenate([context, char_embeddings], axis=1)
    gates = (x @ params["w_ih"].T + params["b_ih"]
             + h_prev @ params["w_hh"].T + params["b_hh"])
    H = h_prev.shape[-1]
    i_g = jax.nn.sigmoid(gates[:, 0 * H:1 * H])
    f_g = jax.nn.sigmoid(gates[:, 1 * H:2 * H])
    g_g = jnp.tanh(gates[:, 2 * H:3 * H])
    o_g = jax.nn.sigmoid(gates[:, 3 * H:4 * H])
    c_new = f_g * c_prev + i_g * g_g
    h_new = o_g * jnp.tanh(c_new)
    return (h_new, c_new), alpha, context


if __name__ == "__main__":
    B, T = 2, 8              # batch, num encoder steps
    D = 32                   # input_size (encoder feature dim)
    H = 32                   # hidden_size
    E = 8                    # num_embeddings
    S = 4                    # decode steps

    key = jax.random.PRNGKey(0)
    ks = jax.random.split(key, 12)
    f32 = jnp.float32

    params = {
        "w_i2h":   0.1 * jax.random.normal(ks[0], (H, D), f32),
        "w_h2h":   0.1 * jax.random.normal(ks[1], (H, H), f32),
        "b_h2h":   0.1 * jax.random.normal(ks[2], (H,), f32),
        "w_score": 0.1 * jax.random.normal(ks[3], (1, H), f32),
        "w_ih":    0.1 * jax.random.normal(ks[4], (4 * H, D + E), f32),
        "b_ih":    0.1 * jax.random.normal(ks[5], (4 * H,), f32),
        "w_hh":    0.1 * jax.random.normal(ks[6], (4 * H, H), f32),
        "b_hh":    0.1 * jax.random.normal(ks[7], (4 * H,), f32),
    }

    h0 = jax.random.normal(ks[8], (B, H), f32)
    c0 = jax.random.normal(ks[9], (B, H), f32)
    batch_H = jax.random.normal(ks[10], (B, T, D), f32)
    embs = jax.random.normal(ks[11], (S, B, E), f32)   # teacher-forced embeddings

    # ---- reference decode loop ----
    h_r, c_r = h0, c0
    ref_h, ref_a, ref_c = [], [], []
    for s in range(S):
        (h_r, c_r), a_r, ctx_r = _reference((h_r, c_r), batch_H, embs[s], params)
        ref_h.append(h_r); ref_a.append(a_r); ref_c.append(ctx_r)
    ref_h = jnp.stack(ref_h)     # [S, B, H]
    ref_a = jnp.stack(ref_a)     # [S, B, T, 1]
    ref_c = jnp.stack(ref_c)     # [S, B, D]

    # ---- 1) fused decode, f32 MXU operands (tight check) ----
    hiddens, c_fin, alphas, contexts = jax.block_until_ready(
        attention_decode((h0, c0), batch_H, embs, params, compute_dtype=jnp.float32))
    assert hiddens.shape == (S, B, H) and c_fin.shape == (B, H)
    assert alphas.shape == (S, B, T, 1) and contexts.shape == (S, B, D)
    np.testing.assert_allclose(np.asarray(hiddens), np.asarray(ref_h), rtol=1e-5, atol=1e-5)
    np.testing.assert_allclose(np.asarray(c_fin), np.asarray(c_r), rtol=1e-5, atol=1e-5)
    np.testing.assert_allclose(np.asarray(alphas), np.asarray(ref_a), rtol=1e-5, atol=1e-5)
    np.testing.assert_allclose(np.asarray(contexts), np.asarray(ref_c), rtol=1e-5, atol=1e-5)

    # ---- 2) fused decode, bf16 MXU operands (relaxed check) ----
    hiddens_b, c_fin_b, alphas_b, contexts_b = jax.block_until_ready(
        attention_decode((h0, c0), batch_H, embs, params, compute_dtype=jnp.bfloat16))
    np.testing.assert_allclose(np.asarray(hiddens_b), np.asarray(ref_h), rtol=1e-1, atol=8e-2)
    np.testing.assert_allclose(np.asarray(c_fin_b), np.asarray(c_r), rtol=1e-1, atol=8e-2)
    np.testing.assert_allclose(np.asarray(alphas_b), np.asarray(ref_a), rtol=1e-1, atol=8e-2)
    np.testing.assert_allclose(np.asarray(contexts_b), np.asarray(ref_c), rtol=1e-1, atol=8e-2)

    # ---- 3) per-step autoregressive path (f32, tight check) ----
    bH_proj = jax.block_until_ready(precompute_batch_H_proj(batch_H, params))
    h, c = h0, c0
    for s in range(S):
        (h, c), alpha, context = attention_cell((h, c), batch_H, embs[s], params,
                                                batch_H_proj=bH_proj)
        np.testing.assert_allclose(np.asarray(h), np.asarray(ref_h[s]), rtol=1e-5, atol=1e-5)
        np.testing.assert_allclose(np.asarray(alpha), np.asarray(ref_a[s]), rtol=1e-5, atol=1e-5)
        np.testing.assert_allclose(np.asarray(context), np.asarray(ref_c[s]), rtol=1e-5, atol=1e-5)
    np.testing.assert_allclose(np.asarray(c), np.asarray(c_r), rtol=1e-5, atol=1e-5)
    jax.block_until_ready((h, c))

    print("KERNEL_OK")
</pallas_src>

<mosaic_0001>
module attributes {stable_mosaic.version = 11 : i64} {
  func.func @_proj_bias_kernel(%arg0: i32, %arg1: memref<16x32xf32, #tpu.memory_space<vmem>>, %arg2: memref<32x32xf32, #tpu.memory_space<vmem>>, %arg3: memref<1x32xf32, #tpu.memory_space<vmem>>, %arg4: memref<16x32xf32, #tpu.memory_space<vmem>>) attributes {dimension_semantics = [#tpu.dimension_semantics<parallel>], iteration_bounds = array<i64: 1>, scalar_prefetch = 0 : i64, scratch_operands = 0 : i64, tpu.core_type = #tpu.core_type<tc>, window_params = [{transform_indices = @transform_0, window_bounds = array<i64: 16, 32>}, {pipeline_mode = #tpu.pipeline_mode<synchronous>, transform_indices = @transform_1, window_bounds = array<i64: 32, 32>}, {pipeline_mode = #tpu.pipeline_mode<synchronous>, transform_indices = @transform_2, window_bounds = array<i64: 1, 32>}, {transform_indices = @transform_3, window_bounds = array<i64: 16, 32>}]} {
    %c0 = arith.constant 0 : index
    %c0_0 = arith.constant 0 : index
    %0 = vector.load %arg1[%c0, %c0_0] : memref<16x32xf32, #tpu.memory_space<vmem>>, vector<16x32xf32>
    %c0_1 = arith.constant 0 : index
    %c0_2 = arith.constant 0 : index
    %1 = vector.load %arg2[%c0_1, %c0_2] : memref<32x32xf32, #tpu.memory_space<vmem>>, vector<32x32xf32>
    %cst = arith.constant dense<0.000000e+00> : vector<16x32xf32>
    %2 = tpu.matmul %0, %1, %cst {dimension_numbers = #tpu.dot_dimension_numbers<[1], [0], [0], [1], [0, 0, 1, 1], [], []>} : vector<16x32xf32>, vector<32x32xf32>, vector<16x32xf32> -> vector<16x32xf32>
    %c0_3 = arith.constant 0 : index
    %c0_4 = arith.constant 0 : index
    %3 = vector.load %arg3[%c0_3, %c0_4] : memref<1x32xf32, #tpu.memory_space<vmem>>, vector<1x32xf32>
    %4 = vector.broadcast %3 : vector<1x32xf32> to vector<16x32xf32>
    %5 = arith.addf %2, %4 : vector<16x32xf32>
    %c0_5 = arith.constant 0 : index
    %c0_6 = arith.constant 0 : index
    %6 = vector.load %arg4[%c0_5, %c0_6] : memref<16x32xf32, #tpu.memory_space<vmem>>, vector<16x32xf32>
    tpu.vector_store %arg4[%c0_5, %c0_6], %5 {strides = array<i32>} : memref<16x32xf32, #tpu.memory_space<vmem>>, vector<16x32xf32>,
    return
  }
  func.func @transform_0(%arg0: i32) -> (i32, i32) {
    %c0_i32 = arith.constant 0 : i32
    %c0_i32_0 = arith.constant 0 : i32
    return %arg0, %c0_i32 : i32, i32
  }
  func.func @transform_1(%arg0: i32) -> (i32, i32) {
    %c0_i32 = arith.constant 0 : i32
    %c0_i32_0 = arith.constant 0 : i32
    %c0_i32_1 = arith.constant 0 : i32
    return %c0_i32, %c0_i32_0 : i32, i32
  }
  func.func @transform_2(%arg0: i32) -> (i32, i32) {
    %c0_i32 = arith.constant 0 : i32
    %c0_i32_0 = arith.constant 0 : i32
    %c0_i32_1 = arith.constant 0 : i32
    return %c0_i32, %c0_i32_0 : i32, i32
  }
  func.func @transform_3(%arg0: i32) -> (i32, i32) {
    %c0_i32 = arith.constant 0 : i32
    %c0_i32_0 = arith.constant 0 : i32
    return %arg0, %c0_i32 : i32, i32
  }
}

</mosaic_0001>

<bundles_post_ra>
// kernel: tpu_custom_call.1
= control target key start
LH: loop header
LB: loop body
LE: loop exit
PB: predicated region body
PF: predicated region fallthrough
CT: control target
= control target key end

     0   :  { %8 = vsyncpa [#allocation3], 0  ;;  %s249_s0 = inlined_call_operand.hbm [shape: f32[16,32], index: 0, kind: input, shape index: {}]   ;;  %s250_s1 = inlined_call_operand.hbm [shape: f32[32,32], index: 1, kind: input, shape index: {}]   ;;  %s251_s2 = inlined_call_operand.vmem [shape: f32[1,32], index: 2, kind: input, shape index: {}]   ;;  %s252_s3 = inlined_call_operand.hbm [shape: f32[16,32], index: 3, kind: output, shape index: {}]  }
   0x1   :  { %9 = vsyncpa [#allocation6], 0 }
   0x2   :  { %10 = vsyncpa [#allocation4], 0  ;;  %s15_s14 = sshll.u32 %s249_s0, 4  ;;  %s199_s15 = smov [#allocation2]   ;;  %s16_s14 = int_to_ptr.hbm [resolvable:$true] %s15_s14 }
   0x3   :  { %s17_s16 = sshll.u32 %s199_s15, 4  ;;  %s28_s19 = sshll.u32 %s250_s1, 4  ;;  %s18_s16 = int_to_ptr.vmem [resolvable:$true] %s17_s16  ;;  %s29_s19 = int_to_ptr.hbm [resolvable:$true] %s28_s19 }
   0x4   :  { %s200_s20 = smov 128   ;;  %s201_s21 = smov 8  }
   0x5   :  { %23 = dma.hbm_to_vmem [thread:$0]  %s16_s14, 256, %s18_s16, [#allocation3], %s200_s20, %s200_s20, %s201_s21  }
   0x6   :  { %s202_s22 = smov [#allocation5]  }
   0x7   :  { %s30_s23 = sshll.u32 %s202_s22, 4  ;;  %s31_s23 = int_to_ptr.vmem [resolvable:$true] %s30_s23 }
   0x8   :  { %36 = dma.hbm_to_vmem [thread:$0]  %s29_s19, 512, %s31_s23, [#allocation6], %s200_s20, %s200_s20, %s201_s21  }
   0x9   :  { %193 = dma.done.wait [#allocation3], 256  }
   0xa   :  { %194 = vsyncadd [#allocation3], 4294967040 }
   0xb   :  { %195 = dma.done.wait [#allocation6], 512  }
   0xc   :  { %196 = vsyncadd [#allocation6], 4294966784  ;;  %v52_v0 = vld [vmem:[#allocation5 + $0x18] sm:$0xff]  ;;  %v51_v1 = vld [vmem:[#allocation5 + $0x10] sm:$0xff]  ;;  %vm57_vm0 = vcmask 261120   ;;  %s203_s24 = smov [#allocation7]  }
   0xd   :  { %76 = vmatpush.msra.mxu0 %v52_v0  ;;  %111 = vmatpush.msra.mxu1 %v52_v0  ;;  %v50_v2 = vld [vmem:[#allocation5 + $0x8] sm:$0xff]  ;;  %v49_v3 = vld [vmem:[#allocation5] sm:$0xff]  ;;  %v47_v4 = vld [vmem:[#allocation2] sm:$0xff]  ;;  %s93_s25 = sshll.u32 %s203_s24, 4  ;;  %s95_s28 = sshll.u32 %s252_s3, 4  ;;  %s94_s25 = int_to_ptr.vmem [resolvable:$true] %s93_s25  ;;  %s96_s28 = int_to_ptr.hbm [resolvable:$true] %s95_s28 }
   0xe   :  { %v48_v5 = vld [vmem:[#allocation2 + $0x8] sm:$0xff]  ;;  %v120_v6 = vld [vmem:[%s251_s2] ss:$0 sm:$0xff] }
   0xf   :  { %77 = vmatpush.msra.mxu0 %v51_v1  ;;  %112 = vmatpush.msra.mxu1 %v51_v1 }
  0x11   :  { %78 = vmatpush.msra.mxu0 %v50_v2  ;;  %113 = vmatpush.msra.mxu1 %v50_v2 }
  0x13   :  { %79 = vmatpush.msra.mxu0 %v49_v3  ;;  %114 = vmatpush.msra.mxu1 %v49_v3 }
  0x14   :  { %109 = vmatmul.msk.f32.vlgmr.msra.gmra.mxu0 %vm57_vm0, %v47_v4  ;;  %110 = vmatmul.msk.f32.vlgmr.msra.gmra.mxu1 %vm57_vm0, %v48_v5 }
  0x91   :  { %v81_v7 = vpop.f32.mrf.mxu0  ;;  %v84_v8 = vpop.f32.mrf.mxu1 }
  0x92   :  { %v82_v9 = vadd.f32 %v120_v6, %v81_v7  ;;  %v85_v10 = vadd.f32 %v120_v6, %v84_v8 }
  0x94   :  { %87 = vst.msk [vmem:[#allocation7] sm:$0xff] %vm57_vm0, %v82_v9 }
  0x95   :  { %88 = vst.msk [vmem:[#allocation7 + $0x8] sm:$0xff] %vm57_vm0, %v85_v10 }
  0x96   :  { %101 = dma.vmem_to_hbm [thread:$0]  %s94_s25, 256, %s96_s28, [#allocation4], %s200_s20, %s200_s20, %s201_s21  }
  0x97   :  { %197 = dma.done.wait [#allocation4], 256  }
  0x98   :  { %198 = vsyncadd [#allocation4], 4294967040 }
  0x99   :  { %106 = vsyncpa [#allocation3], 1 }
  0x9a   :  { %107 = vsyncpa [#allocation6], 1 }
  0x9b   :  { %108 = vsyncpa [#allocation4], 1 }

</bundles_post_ra>
